<compile_context>
chip_gen: v7x
topology: tpu7x:2x2x1
jax: 0.10.0
libtpu: 0.0.40
codegen_flags: <defaults>
</compile_context>

<pallas_src>
import jax
import jax.numpy as jnp
from jax.experimental import pallas as pl
from jax.experimental.pallas import tpu as pltpu

EPS = 1e-8  # torch.nn.CosineSimilarity default eps


def _round_up(x, m):
    return ((x + m - 1) // m) * m


def _choose_block_batch(B, N, D):
    """Batch-block size: multiple of 8 (sublane-aligned packed output), VMEM-capped."""
    per_inst_bytes = 4 * (2 * N * D + N * N + 2 * N + 2)
    cap = max(1, (2 << 20) // per_inst_bytes)          # ~2 MiB of f32 per block
    bb = min(256, cap, _round_up(B, 8))
    return max(8, _round_up(bb, 8))


def _contractive_loss_kernel(emb_ref, lab_ref, len_ref, out_ref):
    """One block of BB independent loss instances per grid step.

    emb_ref: [BB, 2, N, D]  two embedding views (cast to f32 here)
    lab_ref: [BB, N, N]     label_batch (-1 entries are ignored)
    len_ref: [BB, N]        length_batch
    out_ref: [BB, 2]        (batch_loss, total_sents) per instance
    """
    e = emb_ref[...].astype(jnp.float32)                      # [BB, 2, N, D]
    e1 = e[:, 0]                                              # [BB, N, D]
    e2 = e[:, 1]                                              # [BB, N, D]
    lab = lab_ref[...].astype(jnp.float32)                    # [BB, N, N]
    lens = len_ref[...].astype(jnp.float32)                   # [BB, N]

    # ---- pairwise cosine similarity: pre-normalize rows, one batched MXU matmul
    # torch eps semantics are max(||a||*||b||, eps); row pre-normalization uses
    # max(||a||, eps) * max(||b||, eps) -- identical unless a row is near zero.
    inv1 = jax.lax.rsqrt(
        jnp.maximum(jnp.sum(e1 * e1, axis=-1, keepdims=True), EPS * EPS))
    inv2 = jax.lax.rsqrt(
        jnp.maximum(jnp.sum(e2 * e2, axis=-1, keepdims=True), EPS * EPS))
    predictions = jnp.einsum('bnd,bmd->bnm', e1 * inv1, e2 * inv2,
                             preferred_element_type=jnp.float32)   # [BB, N, N]

    # ---- masked L1, per-sentence length normalization, per-instance average --
    mask = (lab != -1.0).astype(jnp.float32)                  # [BB, N, N]
    abs_diff = jnp.abs((predictions - lab) * mask)            # [BB, N, N]
    per_row = jnp.sum(abs_diff, axis=-1)                      # [BB, N]

    valid = (lens != 0.0).astype(jnp.float32)                 # [BB, N]
    total_sents = jnp.sum(valid, axis=-1, keepdims=True)      # [BB, 1]
    # Guarded 1/len: rows with length 0 contribute 0 (torch would propagate inf).
    inv_len = valid / jnp.where(lens != 0.0, lens, 1.0)       # [BB, N]
    loss_sum = jnp.sum(per_row * inv_len, axis=-1, keepdims=True)  # [BB, 1]

    denom = jnp.where(total_sents > 0.0, total_sents, 1.0)
    batch_loss = jnp.where(total_sents > 0.0, loss_sum / denom, 0.0)

    out_ref[:, 0:1] = batch_loss
    out_ref[:, 1:2] = total_sents


@jax.jit
def _batched_contractive_loss(embeddings, label_batch, length_batch):
    """embeddings [B,2,N,D], label_batch [B,N,N], length_batch [B,N] -> ([B],[B])."""
    B, two, N, D = embeddings.shape
    assert two == 2, "embeddings must carry two views along axis 1"

    BB = _choose_block_batch(B, N, D)
    B_pad = _round_up(B, BB)
    if B_pad != B:
        pad = B_pad - B
        # Zero padding: zero rows have length 0 -> total_sents 0 -> loss 0,
        # and they are sliced off below.
        embeddings = jnp.pad(embeddings, ((0, pad), (0, 0), (0, 0), (0, 0)))
        label_batch = jnp.pad(label_batch, ((0, pad), (0, 0), (0, 0)))
        length_batch = jnp.pad(length_batch, ((0, pad), (0, 0)))

    flops = B_pad * (2 * N * N * D + 10 * N * N + 6 * N)
    bytes_accessed = 4 * B_pad * (2 * N * D + N * N + N + 2)

    out = pl.pallas_call(
        _contractive_loss_kernel,
        grid=(B_pad // BB,),
        in_specs=[
            pl.BlockSpec((BB, 2, N, D), lambda b: (b, 0, 0, 0)),
            pl.BlockSpec((BB, N, N), lambda b: (b, 0, 0)),
            pl.BlockSpec((BB, N), lambda b: (b, 0)),
        ],
        out_specs=pl.BlockSpec((BB, 2), lambda b: (b, 0)),
        out_shape=jax.ShapeDtypeStruct((B_pad, 2), jnp.float32),
        compiler_params=pltpu.CompilerParams(dimension_semantics=("parallel",)),
        cost_estimate=pl.CostEstimate(flops=int(flops),
                                      transcendentals=int(2 * B_pad * N),
                                      bytes_accessed=int(bytes_accessed)),
    )(embeddings, label_batch, length_batch)
    return out[:B, 0], out[:B, 1]


def contractive_loss(embeddings, weights, label_batch, length_batch):
    """Matches the torch module's return tuple: (batch_loss, total_sents).

    Accepts a single instance (embeddings [2, N, D]) or a batch of instances
    (embeddings [B, 2, N, D]); many tiny loss instances are processed per grid
    step to amortize launch / per-step pipeline overhead.  `weights` only feeds
    the torch module's dead `loss` value (never returned), so it is not read.
    """
    del weights
    single = embeddings.ndim == 3
    if single:
        embeddings = embeddings[None]
        label_batch = label_batch[None]
        length_batch = length_batch[None]
    bl, ts = _batched_contractive_loss(embeddings, label_batch, length_batch)
    if single:
        return bl[0], ts[0]
    return bl, ts


def _reference(embeddings, label_batch, length_batch):
    """Pure-JAX reference with the same (guarded) semantics."""
    e1 = embeddings[:, 0].astype(jnp.float32)
    e2 = embeddings[:, 1].astype(jnp.float32)
    n1 = jnp.sqrt(jnp.sum(e1 * e1, axis=-1, keepdims=True))
    n2 = jnp.sqrt(jnp.sum(e2 * e2, axis=-1, keepdims=True))
    denom = jnp.maximum(n1 * jnp.swapaxes(n2, -1, -2), EPS)
    pred = jnp.einsum("bnd,bmd->bnm", e1, e2) / denom
    mask = (label_batch != -1.0).astype(jnp.float32)
    diff = jnp.abs(pred * mask - label_batch * mask)
    lens = length_batch.astype(jnp.float32)
    valid = (lens != 0.0).astype(jnp.float32)
    total = jnp.sum(valid, axis=-1)
    per_sent = jnp.sum(diff, axis=-1)
    inv_len = valid / jnp.where(lens != 0.0, lens, 1.0)
    loss = jnp.sum(per_sent * inv_len, axis=-1)
    batch_loss = jnp.where(total > 0.0, loss / jnp.where(total > 0.0, total, 1.0), 0.0)
    return batch_loss, total


if __name__ == "__main__":
    B, N, D = 4, 8, 32
    key = jax.random.PRNGKey(0)
    k1, k2, k3, k4, k5 = jax.random.split(key, 5)

    embeddings = jax.random.normal(k1, (B, 2, N, D), dtype=jnp.float32)
    weights = jax.random.uniform(k2, (B, N), minval=0.5, maxval=1.5, dtype=jnp.float32)
    # labels: ~30% entries are -1 (ignored), rest in [0, 1)
    label_vals = jax.random.uniform(k3, (B, N, N), dtype=jnp.float32)
    label_mask = jax.random.bernoulli(k4, 0.3, (B, N, N))
    label_batch = jnp.where(label_mask, -1.0, label_vals)
    # TODO(synk): length_batch / label_batch are undefined free variables in the
    # original torch forward; they are supplied here as explicit inputs.
    length_batch = jax.random.randint(k5, (B, N), 1, 10).astype(jnp.float32)

    batch_loss, total_sents = contractive_loss(embeddings, weights,
                                               label_batch, length_batch)
    jax.block_until_ready((batch_loss, total_sents))

    ref_loss, ref_total = _reference(embeddings, label_batch, length_batch)
    assert jnp.allclose(batch_loss, ref_loss, rtol=2e-2, atol=2e-2)
    assert jnp.allclose(total_sents, ref_total)
    print("KERNEL_OK")
</pallas_src>

<mosaic_0001>
module attributes {stable_mosaic.version = 11 : i64} {
  func.func @_contractive_loss_kernel(%arg0: i32, %arg1: memref<8x2x8x32xf32, #tpu.memory_space<vmem>>, %arg2: memref<8x8x8xf32, #tpu.memory_space<vmem>>, %arg3: memref<8x8xf32, #tpu.memory_space<vmem>>, %arg4: memref<8x2xf32, #tpu.memory_space<vmem>>) attributes {dimension_semantics = [#tpu.dimension_semantics<parallel>], iteration_bounds = array<i64: 1>, scalar_prefetch = 0 : i64, scratch_operands = 0 : i64, tpu.core_type = #tpu.core_type<tc>, window_params = [{transform_indices = @transform_0, window_bounds = array<i64: 8, 2, 8, 32>}, {transform_indices = @transform_1, window_bounds = array<i64: 8, 8, 8>}, {transform_indices = @transform_2, window_bounds = array<i64: 8, 8>}, {transform_indices = @transform_3, window_bounds = array<i64: 8, 2>}]} {
    %c0 = arith.constant 0 : index
    %c0_0 = arith.constant 0 : index
    %c0_1 = arith.constant 0 : index
    %c0_2 = arith.constant 0 : index
    %0 = vector.load %arg1[%c0, %c0_0, %c0_1, %c0_2] : memref<8x2x8x32xf32, #tpu.memory_space<vmem>>, vector<8x2x8x32xf32>
    %1 = vector.extract_strided_slice %0 {offsets = [0, 0, 0, 0], sizes = [8, 1, 8, 32], strides = [1, 1, 1, 1]} : vector<8x2x8x32xf32> to vector<8x1x8x32xf32>
    %2 = vector.shape_cast %1 : vector<8x1x8x32xf32> to vector<8x8x32xf32>
    %3 = vector.extract_strided_slice %0 {offsets = [0, 1, 0, 0], sizes = [8, 1, 8, 32], strides = [1, 1, 1, 1]} : vector<8x2x8x32xf32> to vector<8x1x8x32xf32>
    %4 = vector.shape_cast %3 : vector<8x1x8x32xf32> to vector<8x8x32xf32>
    %c0_3 = arith.constant 0 : index
    %c0_4 = arith.constant 0 : index
    %c0_5 = arith.constant 0 : index
    %5 = vector.load %arg2[%c0_3, %c0_4, %c0_5] : memref<8x8x8xf32, #tpu.memory_space<vmem>>, vector<8x8x8xf32>
    %c0_6 = arith.constant 0 : index
    %c0_7 = arith.constant 0 : index
    %6 = vector.load %arg3[%c0_6, %c0_7] : memref<8x8xf32, #tpu.memory_space<vmem>>, vector<8x8xf32>
    %7 = arith.mulf %2, %2 : vector<8x8x32xf32>
    %cst = arith.constant dense<0.000000e+00> : vector<8x8xf32>
    %8 = vector.multi_reduction <add>, %7, %cst [2] : vector<8x8x32xf32> to vector<8x8xf32>
    %9 = vector.shape_cast %8 : vector<8x8xf32> to vector<8x8x1xf32>
    %cst_8 = arith.constant 1.000000e-16 : f32
    %10 = vector.broadcast %cst_8 : f32 to vector<8x8x1xf32>
    %11 = arith.maximumf %9, %10 : vector<8x8x1xf32>
    %12 = math.rsqrt %11 : vector<8x8x1xf32>
    %13 = arith.mulf %4, %4 : vector<8x8x32xf32>
    %cst_9 = arith.constant dense<0.000000e+00> : vector<8x8xf32>
    %14 = vector.multi_reduction <add>, %13, %cst_9 [2] : vector<8x8x32xf32> to vector<8x8xf32>
    %15 = vector.shape_cast %14 : vector<8x8xf32> to vector<8x8x1xf32>
    %cst_10 = arith.constant 1.000000e-16 : f32
    %16 = vector.broadcast %cst_10 : f32 to vector<8x8x1xf32>
    %17 = arith.maximumf %15, %16 : vector<8x8x1xf32>
    %18 = math.rsqrt %17 : vector<8x8x1xf32>
    %19 = vector.broadcast %12 : vector<8x8x1xf32> to vector<8x8x32xf32>
    %20 = arith.mulf %2, %19 : vector<8x8x32xf32>
    %21 = vector.broadcast %18 : vector<8x8x1xf32> to vector<8x8x32xf32>
    %22 = arith.mulf %4, %21 : vector<8x8x32xf32>
    "tpu.trace_start"() <{level = 10 : i32, message = "bnd,bmd->bnm"}> : () -> ()
    %cst_11 = arith.constant dense<0.000000e+00> : vector<8x8x8xf32>
    %23 = tpu.matmul %20, %22, %cst_11 {dimension_numbers = #tpu.dot_dimension_numbers<[2], [2], [1], [1], [0, 0, 0, 1, 1, 1], [0], [0]>} : vector<8x8x32xf32>, vector<8x8x32xf32>, vector<8x8x8xf32> -> vector<8x8x8xf32>
    %cst_12 = arith.constant -1.000000e+00 : f32
    "tpu.trace_stop"() : () -> ()
    %24 = vector.broadcast %cst_12 : f32 to vector<8x8x8xf32>
    %25 = arith.cmpf one, %5, %24 : vector<8x8x8xf32>
    %26 = arith.extui %25 : vector<8x8x8xi1> to vector<8x8x8xi32>
    %27 = arith.sitofp %26 : vector<8x8x8xi32> to vector<8x8x8xf32>
    %28 = arith.subf %23, %5 : vector<8x8x8xf32>
    %29 = arith.mulf %28, %27 : vector<8x8x8xf32>
    %30 = math.absf %29 : vector<8x8x8xf32>
    %cst_13 = arith.constant dense<0.000000e+00> : vector<8x8xf32>
    %31 = vector.multi_reduction <add>, %30, %cst_13 [2] : vector<8x8x8xf32> to vector<8x8xf32>
    %cst_14 = arith.constant 0.000000e+00 : f32
    %32 = vector.broadcast %cst_14 : f32 to vector<8x8xf32>
    %33 = arith.cmpf one, %6, %32 : vector<8x8xf32>
    %34 = arith.extui %33 : vector<8x8xi1> to vector<8x8xi32>
    %35 = arith.sitofp %34 : vector<8x8xi32> to vector<8x8xf32>
    %cst_15 = arith.constant dense<0.000000e+00> : vector<8xf32>
    %36 = vector.multi_reduction <add>, %35, %cst_15 [1] : vector<8x8xf32> to vector<8xf32>
    %37 = vector.shape_cast %36 : vector<8xf32> to vector<8x1xf32>
    %cst_16 = arith.constant 0.000000e+00 : f32
    %38 = vector.broadcast %cst_16 : f32 to vector<8x8xf32>
    %39 = arith.cmpf one, %6, %38 : vector<8x8xf32>
    %cst_17 = arith.constant 1.000000e+00 : f32
    %40 = vector.broadcast %cst_17 : f32 to vector<8x8xf32>
    %41 = arith.select %39, %6, %40 : vector<8x8xi1>, vector<8x8xf32>
    %42 = arith.divf %35, %41 : vector<8x8xf32>
    %43 = arith.mulf %31, %42 : vector<8x8xf32>
    %cst_18 = arith.constant dense<0.000000e+00> : vector<8xf32>
    %44 = vector.multi_reduction <add>, %43, %cst_18 [1] : vector<8x8xf32> to vector<8xf32>
    %45 = vector.shape_cast %44 : vector<8xf32> to vector<8x1xf32>
    %cst_19 = arith.constant 0.000000e+00 : f32
    %46 = vector.broadcast %cst_19 : f32 to vector<8x1xf32>
    %47 = arith.cmpf ogt, %37, %46 : vector<8x1xf32>
    %cst_20 = arith.constant 1.000000e+00 : f32
    %48 = vector.broadcast %cst_20 : f32 to vector<8x1xf32>
    %49 = arith.select %47, %37, %48 : vector<8x1xi1>, vector<8x1xf32>
    %cst_21 = arith.constant 0.000000e+00 : f32
    %50 = vector.broadcast %cst_21 : f32 to vector<8x1xf32>
    %51 = arith.cmpf ogt, %37, %50 : vector<8x1xf32>
    %52 = arith.divf %45, %49 : vector<8x1xf32>
    %cst_22 = arith.constant 0.000000e+00 : f32
    %53 = vector.broadcast %cst_22 : f32 to vector<8x1xf32>
    %54 = arith.select %51, %52, %53 : vector<8x1xi1>, vector<8x1xf32>
    %c0_23 = arith.constant 0 : index
    %c0_24 = arith.constant 0 : index
    %55 = vector.load %arg4[%c0_23, %c0_24] : memref<8x2xf32, #tpu.memory_space<vmem>>, vector<8x1xf32>
    tpu.vector_store %arg4[%c0_23, %c0_24], %54 {strides = array<i32>} : memref<8x2xf32, #tpu.memory_space<vmem>>, vector<8x1xf32>,
    %c0_25 = arith.constant 0 : index
    %c1 = arith.constant 1 : index
    %56 = vector.load %arg4[%c0_25, %c1] : memref<8x2xf32, #tpu.memory_space<vmem>>, vector<8x1xf32>
    tpu.vector_store %arg4[%c0_25, %c1], %37 {strides = array<i32>} : memref<8x2xf32, #tpu.memory_space<vmem>>, vector<8x1xf32>,
    return
  }
  func.func @transform_0(%arg0: i32) -> (i32, i32, i32, i32) {
    %c0_i32 = arith.constant 0 : i32
    %c0_i32_0 = arith.constant 0 : i32
    %c0_i32_1 = arith.constant 0 : i32
    %c0_i32_2 = arith.constant 0 : i32
    return %arg0, %c0_i32, %c0_i32_0, %c0_i32_1 : i32, i32, i32, i32
  }
  func.func @transform_1(%arg0: i32) -> (i32, i32, i32) {
    %c0_i32 = arith.constant 0 : i32
    %c0_i32_0 = arith.constant 0 : i32
    %c0_i32_1 = arith.constant 0 : i32
    return %arg0, %c0_i32, %c0_i32_0 : i32, i32, i32
  }
  func.func @transform_2(%arg0: i32) -> (i32, i32) {
    %c0_i32 = arith.constant 0 : i32
    %c0_i32_0 = arith.constant 0 : i32
    return %arg0, %c0_i32 : i32, i32
  }
  func.func @transform_3(%arg0: i32) -> (i32, i32) {
    %c0_i32 = arith.constant 0 : i32
    %c0_i32_0 = arith.constant 0 : i32
    return %arg0, %c0_i32 : i32, i32
  }
}

</mosaic_0001>

<bundles_post_ra>
// kernel: _batched_contractive_loss.1
= control target key start
LH: loop header
LB: loop body
LE: loop exit
PB: predicated region body
PF: predicated region fallthrough
CT: control target
= control target key end

     0   :  { %vm47_vm0 = vcmask 261120   ;;  %v1134_v48 = vmov 0.0   ;;  %vm1135_vm1 = vmmov 0   ;;  %v843_v51 = vlaneseq  ;;  %s1420_s0 = inlined_call_operand.vmem [shape: f32[8,2,8,32], index: 0, kind: input, shape index: {}]   ;;  %s1421_s2 = inlined_call_operand.vmem [shape: f32[8,8], index: 2, kind: input, shape index: {}]   ;;  %s1422_s1 = inlined_call_operand.vmem [shape: f32[8,8,8], index: 1, kind: input, shape index: {}]   ;;  %s1423_s3 = inlined_call_operand.vmem [shape: f32[8,2], index: 3, kind: output, shape index: {}]  }
   0x1   :  { %v1160_v0 = vld [vmem:[%s1420_s0 + $0x8] sm:$0xff]  ;;  %v1165_v1 = vld [vmem:[%s1420_s0] sm:$0xff]  ;;  %v1170_v2 = vld [vmem:[%s1420_s0 + $0x18] sm:$0xff]  ;;  %1053 = vmatprep.subr.mxu0 %v1134_v48  ;;  %1058 = vmatprep.subr.mxu1 %v1134_v48  ;;  %vm808_vm5 = vcmask 64512   ;;  %vm981_vm12 = vcmask 1041409   ;;  %vm983_vm13 = vcmask 1042434  }
   0x2   :  { %v88_v3 = vmul.f32 %v1160_v0, %v1160_v0  ;;  %v39_v4 = vmul.f32 %v1165_v1, %v1165_v1  ;;  %v89_v5 = vmul.f32 %v1170_v2, %v1170_v2  ;;  %v1181_v6 = vld [vmem:[%s1420_s0 + $0x10] sm:$0xff]  ;;  %v1188_v8 = vld [vmem:[%s1420_s0 + $0x28] sm:$0xff]  ;;  %v1193_v9 = vld [vmem:[%s1420_s0 + $0x38] sm:$0xff]  ;;  %1055 = vmatprep.mubr.msk.f32.mxu0 %vm1135_vm1, %v1134_v48  ;;  %1060 = vmatprep.mubr.msk.f32.mxu1 %vm1135_vm1, %v1134_v48  ;;  %v1295_v52 = vshrl.u32 %v843_v51, 7 }
   0x3   :  { %v40_v7 = vmul.f32 %v1181_v6, %v1181_v6  ;;  %v90_v14 = vmul.f32 %v1188_v8, %v1188_v8  ;;  %v91_v15 = vmul.f32 %v1193_v9, %v1193_v9  ;;  %v1206_v16 = vld [vmem:[%s1420_s0 + $0x20] sm:$0xff]  ;;  %v1211_v17 = vld [vmem:[%s1420_s0 + $0x30] sm:$0xff]  ;;  %v1222_v22 = vld [vmem:[%s1420_s0 + $0x48] sm:$0xff]  ;;  %vm985_vm14 = vcmask 1043459  }
   0x4   :  { %v96_v10 = vsel %vm47_vm0, %v88_v3, 0.0  ;;  %v48_v11 = vsel %vm47_vm0, %v39_v4, 0.0  ;;  %v99_v12 = vsel %vm47_vm0, %v89_v5, 0.0  ;;  %v41_v20 = vmul.f32 %v1206_v16, %v1206_v16  ;;  %v1227_v23 = vld [vmem:[%s1420_s0 + $0x58] sm:$0xff]  ;;  %v1238_v28 = vld [vmem:[%s1420_s0 + $0x40] sm:$0xff]  ;;  %v1243_v29 = vld [vmem:[%s1420_s0 + $0x50] sm:$0xff] }
   0x5   :  { %97 = vadd.xlane.f32.xlu0 %v96_v10  ;;  %49 = vadd.xlane.f32.xlu1 %v48_v11  ;;  %v51_v13 = vsel %vm47_vm0, %v40_v7, 0.0  ;;  %v102_v18 = vsel %vm47_vm0, %v90_v14, 0.0  ;;  %v105_v19 = vsel %vm47_vm0, %v91_v15, 0.0  ;;  %v42_v21 = vmul.f32 %v1211_v17, %v1211_v17  ;;  %v1254_v34 = vld [vmem:[%s1420_s0 + $0x68] sm:$0xff]  ;;  %v1259_v35 = vld [vmem:[%s1420_s0 + $0x78] sm:$0xff]  ;;  %v1270_v40 = vld [vmem:[%s1420_s0 + $0x60] sm:$0xff] }
   0x6   :  { %v54_v24 = vsel %vm47_vm0, %v41_v20, 0.0  ;;  %v92_v26 = vmul.f32 %v1222_v22, %v1222_v22  ;;  %v93_v27 = vmul.f32 %v1227_v23, %v1227_v23  ;;  %v43_v32 = vmul.f32 %v1238_v28, %v1238_v28  ;;  %v1275_v41 = vld [vmem:[%s1420_s0 + $0x70] sm:$0xff]  ;;  %v38_v49 = vld [vmem:[%s1421_s2] sm:$0xff] }
   0x7   :  { %v57_v25 = vsel %vm47_vm0, %v42_v21, 0.0  ;;  %v44_v33 = vmul.f32 %v1243_v29, %v1243_v29  ;;  %v94_v38 = vmul.f32 %v1254_v34, %v1254_v34  ;;  %v95_v39 = vmul.f32 %v1259_v35, %v1259_v35 }
   0x8   :  { %v108_v30 = vsel %vm47_vm0, %v92_v26, 0.0  ;;  %v111_v31 = vsel %vm47_vm0, %v93_v27, 0.0  ;;  %v60_v36 = vsel %vm47_vm0, %v43_v32, 0.0  ;;  %v45_v44 = vmul.f32 %v1270_v40, %v1270_v40 }
   0x9   :  { %100 = vadd.xlane.f32.xlu0 %v99_v12  ;;  %52 = vadd.xlane.f32.xlu1 %v51_v13  ;;  %v63_v37 = vsel %vm47_vm0, %v44_v33, 0.0  ;;  %v114_v42 = vsel %vm47_vm0, %v94_v38, 0.0  ;;  %v117_v43 = vsel %vm47_vm0, %v95_v39, 0.0  ;;  %v46_v45 = vmul.f32 %v1275_v41, %v1275_v41 }
   0xa   :  { %v66_v46 = vsel %vm47_vm0, %v45_v44, 0.0  ;;  %vm833_vm2 = vcmp.ne.f32.partialorder %v38_v49, 0.0  ;;  %v852_v54 = vsub.s32 1, %v1295_v52  ;;  %v845_v55 = vsub.s32 0, %v1295_v52 }
   0xb   :  { %v69_v47 = vsel %vm47_vm0, %v46_v45, 0.0  ;;  %v839_v50 = vsel %vm833_vm2, %v38_v49, 1.0  ;;  %v1298_v53 = vsel %vm833_vm2, 1.0, %v1134_v48  ;;  %v859_v58 = vsub.s32 2, %v1295_v52 }
   0xc   :  { %1098 = vrcp.f32 %v839_v50  ;;  %v873_v59 = vsub.s32 4, %v1295_v52  ;;  %v866_v63 = vsub.s32 3, %v1295_v52  ;;  %v880_v5 = vsub.s32 5, %v1295_v52 }
   0xd   :  { %103 = vadd.xlane.f32.xlu0 %v102_v18  ;;  %106 = vadd.xlane.f32.xlu1 %v105_v19  ;;  %vm987_vm15 = vcmask 1044484   ;;  %vm993_vm2 = vcmask 1047559  }
  0x11   :  { %55 = vadd.xlane.f32.xlu0 %v54_v24  ;;  %58 = vadd.xlane.f32.xlu1 %v57_v25 }
  0x15   :  { %109 = vadd.xlane.f32.xlu0 %v108_v30  ;;  %112 = vadd.xlane.f32.xlu1 %v111_v31 }
  0x16   :  { %v1099_v56 = vpop.eup %1098 }
  0x17   :  { %v1303_v57 = vmul.f32 %v1099_v56, %v1298_v53 }
  0x19   :  { %61 = vadd.xlane.f32.xlu0 %v60_v36  ;;  %64 = vadd.xlane.f32.xlu1 %v63_v37  ;;  %v853_v60 = vrot.slane %v1303_v57, %v852_v54  ;;  %v846_v61 = vrot.slane %v1303_v57, %v845_v55  ;;  %v860_v62 = vrot.slane %v1303_v57, %v859_v58 }
  0x1a   :  { %v874_v3 = vrot.slane %v1303_v57, %v873_v59  ;;  %v867_v4 = vrot.slane %v1303_v57, %v866_v63  ;;  %v881_v7 = vrot.slane %v1303_v57, %v880_v5 }
  0x1d   :  { %115 = vadd.xlane.f32.xlu0 %v114_v42  ;;  %118 = vadd.xlane.f32.xlu1 %v117_v43 }
  0x21   :  { %67 = vadd.xlane.f32.xlu0 %v66_v46  ;;  %70 = vadd.xlane.f32.xlu1 %v69_v47 }
  0x32   :  { %855 = vbcast.lane.b32.xlu1 %v853_v60, 256 }
  0x36   :  { %862 = vbcast.lane.b32.xlu1 %v860_v62, 256 }
  0x37   :  { %848 = vbcast.lane.b32.xlu0 %v846_v61, 256 }
  0x3a   :  { %869 = vbcast.lane.b32.xlu1 %v867_v4, 256 }
  0x3b   :  { %876 = vbcast.lane.b32.xlu0 %v874_v3, 256 }
  0x3e   :  { %883 = vbcast.lane.b32.xlu1 %v881_v7, 256 }
  0x92   :  { %v98_v10 = vpop.xlane.xlu0 %97  ;;  %v50_v11 = vpop.xlane.xlu1 %49 }
  0x93   :  { %v120_v12 = vmax.f32 %v98_v10, 1e-16  ;;  %v72_v13 = vmax.f32 %v50_v11, 1e-16 }
  0x95   :  { %1100 = vrsqrt.f32 %v120_v12 }
  0x96   :  { %1102 = vrsqrt.f32 %v72_v13  ;;  %v101_v14 = vpop.xlane.xlu0 %100  ;;  %v53_v15 = vpop.xlane.xlu1 %52 }
  0x97   :  { %v121_v18 = vmax.f32 %v101_v14, 1e-16  ;;  %v73_v19 = vmax.f32 %v53_v15, 1e-16 }
  0x99   :  { %1104 = vrsqrt.f32 %v121_v18 }
  0x9a   :  { %1106 = vrsqrt.f32 %v73_v19  ;;  %v104_v20 = vpop.xlane.xlu0 %103  ;;  %v107_v21 = vpop.xlane.xlu1 %106 }
  0x9b   :  { %v122_v24 = vmax.f32 %v104_v20, 1e-16  ;;  %v123_v25 = vmax.f32 %v107_v21, 1e-16 }
  0x9d   :  { %1108 = vrsqrt.f32 %v122_v24 }
  0x9e   :  { %1110 = vrsqrt.f32 %v123_v25  ;;  %v56_v26 = vpop.xlane.xlu0 %55  ;;  %v59_v27 = vpop.xlane.xlu1 %58 }
  0x9f   :  { %v1101_v30 = vpop.eup %1100  ;;  %v74_v31 = vmax.f32 %v56_v26, 1e-16  ;;  %v75_v32 = vmax.f32 %v59_v27, 1e-16  ;;  %v32_v26 = vld [vmem:[%s1422_s1 + $0x10] sm:$0xff] }
  0xa0   :  { %v1103_v33 = vpop.eup %1102  ;;  %v144_v36 = vmul.f32 %v1101_v30, %v1160_v0  ;;  %vm762_vm6 = vcmp.ne.f32.partialorder %v32_v26, -1.0 }
  0xa1   :  { %1112 = vrsqrt.f32 %v74_v31  ;;  %v136_v44 = vmul.f32 %v1103_v33, %v1165_v1  ;;  %v33_v31 = vld [vmem:[%s1422_s1 + $0x18] sm:$0xff] }
  0xa2   :  { %1114 = vrsqrt.f32 %v75_v32  ;;  %1054 = vmatpush3.xpose.msk.msra.mxu0 %vm47_vm0, %v144_v36  ;;  %v110_v37 = vpop.xlane.xlu0 %109  ;;  %v113_v38 = vpop.xlane.xlu1 %112  ;;  %vm763_vm7 = vcmp.ne.f32.partialorder %v33_v31, -1.0 }
  0xa3   :  { %v1105_v39 = vpop.eup %1104  ;;  %v124_v42 = vmax.f32 %v110_v37, 1e-16  ;;  %v125_v43 = vmax.f32 %v113_v38, 1e-16  ;;  %1063 = vmatprep.subr.mxu0 %v1134_v48 }
  0xa4   :  { %v1107_v45 = vpop.eup %1106  ;;  %v145_v46 = vmul.f32 %v1105_v39, %v1170_v2 }
  0xa5   :  { %1116 = vrsqrt.f32 %v124_v42  ;;  %1056 = vmatmul.mubr.msk.f32.vlgmr.msra.gmra.mrb[0].mxu0 %vm47_vm0, %v136_v44  ;;  %v137_v1 = vmul.f32 %v1107_v45, %v1181_v6  ;;  %v1030_v42 = vsel %vm762_vm6, 1.0, %v1134_v48  ;;  %vm1006_vm6 = vcmask 15368  }
  0xa6   :  { %1118 = vrsqrt.f32 %v125_v43  ;;  %1059 = vmatpush3.xpose.msk.msra.mxu1 %vm47_vm0, %v145_v46  ;;  %v62_v0 = vpop.xlane.xlu0 %61  ;;  %v65_v47 = vpop.xlane.xlu1 %64  ;;  %1065 = vmatprep.mubr.msk.f32.mxu0 %vm1135_vm1, %v1134_v48  ;;  %v1031_v46 = vsel %vm763_vm7, 1.0, %v1134_v48 }
  0xa7   :  { %v1109_v49 = vpop.eup %1108  ;;  %v76_v50 = vmax.f32 %v62_v0, 1e-16  ;;  %v77_v54 = vmax.f32 %v65_v47, 1e-16  ;;  %1068 = vmatprep.subr.mxu1 %v1134_v48 }
  0xa8   :  { %v1111_v55 = vpop.eup %1110  ;;  %v146_v2 = vmul.f32 %v1109_v49, %v1188_v8 }
  0xa9   :  { %1120 = vrsqrt.f32 %v76_v50  ;;  %1061 = vmatmul.mubr.msk.f32.vlgmr.msra.gmra.mrb[0].mxu1 %vm47_vm0, %v137_v1  ;;  %v147_v56 = vmul.f32 %v1111_v55, %v1193_v9  ;;  %v35_v55 = vld [vmem:[%s1422_s1 + $0x28] sm:$0xff] }
  0xaa   :  { %1122 = vrsqrt.f32 %v77_v54  ;;  %v116_v58 = vpop.xlane.xlu0 %115  ;;  %1064 = vmatpush3.xpose.msk.msra.mxu0 %vm47_vm0, %v146_v2  ;;  %v119_v59 = vpop.xlane.xlu1 %118  ;;  %1070 = vmatprep.mubr.msk.f32.mxu1 %vm1135_vm1, %v1134_v48  ;;  %v34_v54 = vld [vmem:[%s1422_s1 + $0x20] sm:$0xff]  ;;  %vm765_vm9 = vcmp.ne.f32.partialorder %v35_v55, -1.0 }
  0xab   :  { %v1113_v60 = vpop.eup %1112  ;;  %v126_v6 = vmax.f32 %v116_v58, 1e-16  ;;  %v127_v61 = vmax.f32 %v119_v59, 1e-16  ;;  %1069 = vmatpush3.xpose.msk.msra.mxu1 %vm47_vm0, %v147_v56  ;;  %1073 = vmatprep.subr.mxu0 %v1134_v48  ;;  %vm764_vm8 = vcmp.ne.f32.partialorder %v34_v54, -1.0 }
  0xac   :  { %v1115_v8 = vpop.eup %1114  ;;  %v138_v62 = vmul.f32 %v1113_v60, %v1206_v16  ;;  %1078 = vmatprep.subr.mxu1 %v1134_v48 }
  0xad   :  { %1124 = vrsqrt.f32 %v126_v6  ;;  %v139_v9 = vmul.f32 %v1115_v8, %v1211_v17  ;;  %v1032_v6 = vsel %vm764_vm8, 1.0, %v1134_v48 }
  0xae   :  { %1126 = vrsqrt.f32 %v127_v61  ;;  %v68_v63 = vpop.xlane.xlu0 %67  ;;  %1066 = vmatmul.mubr.msk.f32.vlgmr.msra.gmra.mrb[2].mxu0 %vm47_vm0, %v138_v62  ;;  %v71_v3 = vpop.xlane.xlu1 %70 }
  0xaf   :  { %v1117_v4 = vpop.eup %1116  ;;  %v78_v5 = vmax.f32 %v68_v63, 1e-16  ;;  %1071 = vmatmul.mubr.msk.f32.vlgmr.msra.gmra.mrb[2].mxu1 %vm47_vm0, %v139_v9  ;;  %v79_v7 = vmax.f32 %v71_v3, 1e-16  ;;  %1075 = vmatprep.mubr.msk.f32.mxu0 %vm1135_vm1, %v1134_v48  ;;  %v1033_v9 = vsel %vm765_vm9, 1.0, %v1134_v48 }
  0xb0   :  { %v1119_v10 = vpop.eup %1118  ;;  %v148_v16 = vmul.f32 %v1117_v4, %v1222_v22  ;;  %1080 = vmatprep.mubr.msk.f32.mxu1 %vm1135_vm1, %v1134_v48 }
  0xb1   :  { %1128 = vrsqrt.f32 %v78_v5  ;;  %v149_v17 = vmul.f32 %v1119_v10, %v1227_v23  ;;  %v36_v5 = vld [vmem:[%s1422_s1 + $0x30] sm:$0xff]  ;;  %v37_v10 = vld [vmem:[%s1422_s1 + $0x38] sm:$0xff] }
  0xb2   :  { %1130 = vrsqrt.f32 %v79_v7  ;;  %1074 = vmatpush3.xpose.msk.msra.mxu0 %vm47_vm0, %v148_v16  ;;  %vm766_vm10 = vcmp.ne.f32.partialorder %v36_v5, -1.0  ;;  %vm767_vm11 = vcmp.ne.f32.partialorder %v37_v10, -1.0 }
  0xb3   :  { %v1121_v11 = vpop.eup %1120  ;;  %1079 = vmatpush3.xpose.msk.msra.mxu1 %vm47_vm0, %v149_v17  ;;  %1083 = vmatprep.subr.mxu0 %v1134_v48 }
  0xb4   :  { %v1123_v12 = vpop.eup %1122  ;;  %v140_v13 = vmul.f32 %v1121_v11, %v1238_v28  ;;  %1088 = vmatprep.subr.mxu1 %v1134_v48 }
  0xb5   :  { %v141_v22 = vmul.f32 %v1123_v12, %v1243_v29  ;;  %v1136_v12 = vmov 0  }
  0xb6   :  { %1076 = vmatmul.mubr.msk.f32.vlgmr.msra.gmra.mrb[4].mxu0 %vm47_vm0, %v140_v13  ;;  %1096 = vset.pattern.permute.xlu0 %v1136_v12 }
  0xb7   :  { %v1125_v14 = vpop.eup %1124  ;;  %1081 = vmatmul.mubr.msk.f32.vlgmr.msra.gmra.mrb[4].mxu1 %vm47_vm0, %v141_v22  ;;  %1085 = vmatprep.mubr.msk.f32.mxu0 %vm1135_vm1, %v1134_v48 }
  0xb8   :  { %v1127_v23 = vpop.eup %1126  ;;  %v150_v15 = vmul.f32 %v1125_v14, %v1254_v34  ;;  %1090 = vmatprep.mubr.msk.f32.mxu1 %vm1135_vm1, %v1134_v48  ;;  %v30_v34 = vld [vmem:[%s1422_s1] sm:$0xff]  ;;  %1097 = vset.pattern.permute.xlu1 %v1136_v12  ;;  %v1034_v14 = vsel %vm766_vm10, 1.0, %v1134_v48  ;;  %vm991_vm1 = vcmask 1046534  }
  0xb9   :  { %v151_v28 = vmul.f32 %v1127_v23, %v1259_v35  ;;  %vm760_vm3 = vcmp.ne.f32.partialorder %v30_v34, -1.0  ;;  %v31_v35 = vld [vmem:[%s1422_s1 + $0x8] sm:$0xff] }
  0xba   :  { %1084 = vmatpush3.xpose.msk.msra.mxu0 %vm47_vm0, %v150_v15  ;;  %v1028_v24 = vsel %vm760_vm3, 1.0, %v1134_v48  ;;  %vm761_vm4 = vcmp.ne.f32.partialorder %v31_v35, -1.0 }
  0xbb   :  { %v1129_v18 = vpop.eup %1128  ;;  %1089 = vmatpush3.xpose.msk.msra.mxu1 %vm47_vm0, %v151_v28  ;;  %v1029_v30 = vsel %vm761_vm4, 1.0, %v1134_v48  ;;  %vm1004_vm4 = vcmask 7168  }
  0xbc   :  { %v1131_v29 = vpop.eup %1130  ;;  %v142_v19 = vmul.f32 %v1129_v18, %v1270_v40  ;;  %v1035_v18 = vsel %vm767_vm11, 1.0, %v1134_v48 }
  0xbd   :  { %v143_v20 = vmul.f32 %v1131_v29, %v1275_v41 }
  0xbe   :  { %1086 = vmatmul.mubr.msk.f32.vlgmr.msra.gmra.mrb[6].mxu0 %vm47_vm0, %v142_v19 }
  0xbf   :  { %1091 = vmatmul.mubr.msk.f32.vlgmr.msra.gmra.mrb[6].mxu1 %vm47_vm0, %v143_v20  ;;  %vm989_vm0 = vcmask 1045509  }
 0x178   :  { %v224_v21 = vpop.f32.mrb[0].mxu0 }
 0x179   :  { %v784_v25 = vsub.f32 %v224_v21, %v30_v34  ;;  %v1057_v40 = vpop.f32.mrb[1].mxu0 }
 0x17b   :  { %v792_v41 = vmul.f32 %v1028_v24, %v784_v25 }
 0x17c   :  { %v300_v27 = vpop.f32.mrb[0].mxu1 }
 0x17d   :  { %v785_v32 = vsub.f32 %v300_v27, %v31_v35  ;;  %v1062_v33 = vpop.f32.mrb[1].mxu1  ;;  %v800_v36 = vand.u32 2147483647, %v792_v41  ;;  %v894_v41 = vsub.s32 7, %v1295_v52 }
 0x17f   :  { %v793_v37 = vmul.f32 %v1029_v30, %v785_v32  ;;  %v809_v38 = vsel %vm808_vm5, %v800_v36, 0.0  ;;  %v895_v27 = vrot.slane %v1303_v57, %v894_v41  ;;  %v856_v30 = vpop.permute.xlu1 %855  ;;  %v849_v32 = vpop.permute.xlu0 %848 }
 0x180   :  { %810 = vadd.xlane.f32.xlu0 %v809_v38 }
 0x181   :  { %v376_v39 = vpop.f32.mrb[2].mxu0  ;;  %v801_v43 = vand.u32 2147483647, %v793_v37 }
 0x182   :  { %v786_v44 = vsub.f32 %v376_v39, %v32_v26  ;;  %v452_v45 = vpop.f32.mrb[2].mxu1  ;;  %v1067_v0 = vpop.f32.mrb[3].mxu0  ;;  %v887_v26 = vsub.s32 6, %v1295_v52 }
 0x183   :  { %v787_v47 = vsub.f32 %v452_v45, %v33_v31  ;;  %v1072_v49 = vpop.f32.mrb[3].mxu1  ;;  %v812_v50 = vsel %vm808_vm5, %v801_v43, 0.0  ;;  %v863_v31 = vpop.permute.xlu1 %862 }
 0x184   :  { %v794_v1 = vmul.f32 %v1030_v42, %v786_v44  ;;  %813 = vadd.xlane.f32.xlu1 %v812_v50  ;;  %v888_v48 = vrot.slane %v1303_v57, %v887_v26  ;;  %v877_v36 = vpop.permute.xlu0 %876 }
 0x185   :  { %v795_v2 = vmul.f32 %v1031_v46, %v787_v47 }
 0x186   :  { %v802_v56 = vand.u32 2147483647, %v794_v1 }
 0x187   :  { %v803_v58 = vand.u32 2147483647, %v795_v2  ;;  %v870_v33 = vpop.permute.xlu1 %869 }
 0x188   :  { %v815_v59 = vsel %vm808_vm5, %v802_v56, 0.0 }
 0x189   :  { %816 = vadd.xlane.f32.xlu0 %v815_v59  ;;  %v528_v60 = vpop.f32.mrb[4].mxu0  ;;  %v818_v61 = vsel %vm808_vm5, %v803_v58, 0.0  ;;  %v836_v59 = vsel %vm808_vm5, %v1298_v53, 0.0 }
 0x18a   :  { %v788_v8 = vsub.f32 %v528_v60, %v34_v54  ;;  %819 = vadd.xlane.f32.xlu1 %v818_v61  ;;  %v604_v62 = vpop.f32.mrb[4].mxu1  ;;  %v1077_v63 = vpop.f32.mrb[5].mxu0 }
 0x18b   :  { %v789_v3 = vsub.f32 %v604_v62, %v35_v55  ;;  %v1082_v4 = vpop.f32.mrb[5].mxu1  ;;  %v884_v37 = vpop.permute.xlu1 %883 }
 0x18c   :  { %v796_v7 = vmul.f32 %v1032_v6, %v788_v8  ;;  %v948_v6 = vand.u32 127, %v843_v51 }
 0x18d   :  { %v797_v16 = vmul.f32 %v1033_v9, %v789_v3 }
 0x18e   :  { %v804_v17 = vand.u32 2147483647, %v796_v7  ;;  %v951_v8 = vsub.s32 %v948_v6, %v1295_v52 }
 0x18f   :  { %v805_v11 = vand.u32 2147483647, %v797_v16 }
 0x190   :  { %v821_v13 = vsel %vm808_vm5, %v804_v17, 0.0 }
 0x191   :  { %822 = vadd.xlane.f32.xlu0 %v821_v13  ;;  %v680_v22 = vpop.f32.mrb[6].mxu0  ;;  %v824_v23 = vsel %vm808_vm5, %v805_v11, 0.0 }
 0x192   :  { %v790_v15 = vsub.f32 %v680_v22, %v36_v5  ;;  %825 = vadd.xlane.f32.xlu1 %v824_v23  ;;  %v756_v28 = vpop.f32.mrb[6].mxu1  ;;  %v1087_v29 = vpop.f32.mrb[7].mxu0 }
 0x193   :  { %v791_v19 = vsub.f32 %v756_v28, %v37_v10  ;;  %v1092_v20 = vpop.f32.mrb[7].mxu1 }
 0x194   :  { %v798_v34 = vmul.f32 %v1034_v14, %v790_v15 }
 0x195   :  { %v799_v35 = vmul.f32 %v1035_v18, %v791_v19 }
 0x196   :  { %v806_v21 = vand.u32 2147483647, %v798_v34 }
 0x197   :  { %v807_v24 = vand.u32 2147483647, %v799_v35 }
 0x198   :  { %v827_v25 = vsel %vm808_vm5, %v806_v21, 0.0 }
 0x199   :  { %828 = vadd.xlane.f32.xlu0 %v827_v25  ;;  %v830_v40 = vsel %vm808_vm5, %v807_v24, 0.0 }
 0x19a   :  { %831 = vadd.xlane.f32.xlu1 %v830_v40 }
 0x1ab   :  { %897 = vbcast.lane.b32.xlu1 %v895_v27, 256 }
 0x1af   :  { %890 = vbcast.lane.b32.xlu0 %v888_v48, 256 }
 0x20d   :  { %v811_v38 = vpop.xlane.xlu0 %810 }
 0x20e   :  { %v907_v39 = vmul.f32 %v849_v32, %v811_v38 }
 0x210   :  { %924 = vperm.xlu0 %1096, %v907_v39  }
 0x211   :  { %v814_v42 = vpop.xlane.xlu1 %813 }
 0x212   :  { %v908_v43 = vmul.f32 %v856_v30, %v814_v42 }
 0x214   :  { %927 = vperm.xlu1 %1097, %v908_v43  }
 0x216   :  { %v817_v44 = vpop.xlane.xlu0 %816 }
 0x217   :  { %v909_v45 = vmul.f32 %v863_v31, %v817_v44  ;;  %v820_v46 = vpop.xlane.xlu1 %819 }
 0x218   :  { %v910_v0 = vmul.f32 %v870_v33, %v820_v46 }
 0x219   :  { %930 = vperm.xlu1 %1097, %v909_v45  }
 0x21a   :  { %933 = vperm.xlu0 %1096, %v910_v0  }
 0x21e   :  { %v823_v57 = vpop.xlane.xlu0 %822 }
 0x21f   :  { %v911_v47 = vmul.f32 %v877_v36, %v823_v57  ;;  %v826_v49 = vpop.xlane.xlu1 %825 }
 0x220   :  { %v912_v50 = vmul.f32 %v884_v37, %v826_v49 }
 0x221   :  { %936 = vperm.xlu1 %1097, %v911_v47  }
 0x222   :  { %939 = vperm.xlu0 %1096, %v912_v50  }
 0x226   :  { %v829_v54 = vpop.xlane.xlu0 %828 }
 0x227   :  { %v832_v1 = vpop.xlane.xlu1 %831 }
 0x22a   :  { %v891_v55 = vpop.permute.xlu0 %890 }
 0x22b   :  { %v913_v2 = vmul.f32 %v891_v55, %v829_v54  ;;  %v898_v56 = vpop.permute.xlu1 %897 }
 0x22c   :  { %v914_v58 = vmul.f32 %v898_v56, %v832_v1 }
 0x22d   :  { %942 = vperm.xlu1 %1097, %v913_v2  }
 0x22e   :  { %945 = vperm.xlu0 %1096, %v914_v58  }
 0x251   :  { %837 = vadd.xlane.f32.xlu1 %v836_v59 }
 0x28f   :  { %v925_v61 = vpop.permute.xlu0 %924 }
 0x290   :  { %v952_v4 = vrot.slane %v925_v61, %v951_v8 }
 0x293   :  { %v928_v60 = vpop.permute.xlu1 %927 }
 0x294   :  { %v956_v9 = vrot.slane %v928_v60, %v951_v8 }
 0x296   :  { %v982_v7 = vsel %vm981_vm12, %v956_v9, %v952_v4 }
 0x298   :  { %v931_v62 = vpop.permute.xlu1 %930 }
 0x299   :  { %v934_v63 = vpop.permute.xlu0 %933  ;;  %v960_v3 = vrot.slane %v931_v62, %v951_v8 }
 0x29a   :  { %v964_v10 = vrot.slane %v934_v63, %v951_v8 }
 0x29b   :  { %v984_v16 = vsel %vm983_vm13, %v960_v3, %v982_v7 }
 0x29c   :  { %v986_v51 = vsel %vm985_vm14, %v964_v10, %v984_v16 }
 0x2a0   :  { %v937_v5 = vpop.permute.xlu1 %936 }
 0x2a1   :  { %v940_v17 = vpop.permute.xlu0 %939  ;;  %v968_v53 = vrot.slane %v937_v5, %v951_v8 }
 0x2a2   :  { %v972_v11 = vrot.slane %v940_v17, %v951_v8 }
 0x2a3   :  { %v988_v12 = vsel %vm987_vm15, %v968_v53, %v986_v51 }
 0x2a4   :  { %v990_v23 = vsel %vm989_vm0, %v972_v11, %v988_v12 }
 0x2ac   :  { %v943_v52 = vpop.permute.xlu1 %942 }
 0x2ad   :  { %v946_v13 = vpop.permute.xlu0 %945  ;;  %v976_v22 = vrot.slane %v943_v52, %v951_v8 }
 0x2ae   :  { %v980_v14 = vrot.slane %v946_v13, %v951_v8 }
 0x2af   :  { %v992_v15 = vsel %vm991_vm1, %v976_v22, %v990_v23 }
 0x2b0   :  { %v994_v28 = vsel %vm993_vm2, %v980_v14, %v992_v15 }
 0x2b1   :  { %v996_v18 = vsel %vm808_vm5, %v994_v28, 0.0 }
 0x2b2   :  { %997 = vadd.xlane.f32.xlu0 %v996_v18 }
 0x2de   :  { %v838_v29 = vpop.xlane.xlu1 %837 }
 0x2df   :  { %vm999_vm3 = vcmp.gt.f32.partialorder %v838_v29, 0.0 }
 0x2e0   :  { %v1000_v19 = vsel %vm999_vm3, %v838_v29, 1.0 }
 0x2e1   :  { %1132 = vrcp.f32 %v1000_v19 }
 0x2eb   :  { %v1133_v20 = vpop.eup %1132 }
 0x33f   :  { %v998_v34 = vpop.xlane.xlu0 %997 }
 0x340   :  { %v1002_v35 = vmul.f32 %v1133_v20, %v998_v34 }
 0x342   :  { %v1003_v21 = vsel %vm999_vm3, %v1002_v35, 0.0 }
 0x343   :  { %1005 = vst.msk [vmem:[%s1423_s3] sm:$0xff] %vm1004_vm4, %v1003_v21 }
 0x344   :  { %1007 = vst.msk [vmem:[%s1423_s3] sm:$0xff] %vm1006_vm6, %v838_v29 }

</bundles_post_ra>
